<compile_context>
chip_gen: v5e
topology: v5e:2x2
jax: 0.10.0
libtpu: 0.0.40
codegen_flags: <defaults>
</compile_context>

<pallas_src>
import math
import functools

import jax
import jax.numpy as jnp
import numpy as np
from jax.experimental import pallas as pl
from jax.experimental.pallas import tpu as pltpu


_REF_PARAM_ORDER = ("wq", "bq", "wk", "bk", "wv", "bv", "wo", "bo",
                    "w1", "b1", "w2", "b2", "g1", "be1", "g2", "be2")


# --------------------------------- kernel ---------------------------------------


def _layernorm(x, gamma, beta, eps=1e-5):
    mean = jnp.mean(x, axis=-1, keepdims=True)
    var = jnp.mean((x - mean) ** 2, axis=-1, keepdims=True)
    return (x - mean) * jax.lax.rsqrt(var + eps) * gamma + beta


def encoder_stack_kernel(x_ref,
                         wqkv_ref, bqkv_ref, wo_ref, bo_ref,
                         w1_ref, b1_ref, w2_ref, b2_ref,
                         g1_ref, be1_ref, g2_ref, be2_ref,
                         o_ref,
                         *, block_b, seq_len, num_heads, head_dim,
                         dim_ff, ff_chunk, compute_dtype):
    """Applies encoder layer `pl.program_id(1)` to the rows of the current batch
    tile.  The activation is carried across the innermost (layer) grid axis inside
    the output block itself (its index_map is constant along that axis)."""
    layer = pl.program_id(1)
    f32 = jnp.float32
    cdt = compute_dtype

    # Load the input rows into the carried activation block at the first layer.
    @pl.when(layer == 0)
    def _():
        o_ref[...] = x_ref[...]

    x = o_ref[...]                                # (N, D), N = block_b * seq_len
    n_rows, D = x.shape

    # ---- fused Q/K/V projection (single wide matmul) ---------------------------
    qkv = jnp.dot(x.astype(cdt), wqkv_ref[...],
                  preferred_element_type=f32) + bqkv_ref[...]      # (N, 3D)
    q = qkv[:, 0:D]
    k = qkv[:, D:2 * D]
    v = qkv[:, 2 * D:3 * D]

    q3 = q.reshape(block_b, seq_len, D)
    k3 = k.reshape(block_b, seq_len, D)
    v3 = v.reshape(block_b, seq_len, D)

    inv_scale = 1.0 / math.sqrt(head_dim)

    # TODO(synk): optional additive attention mask not implemented (mask=None path);
    # for long sequences, tile over K/V blocks with online softmax instead of the
    # full (block_b, T, T) score tensor.
    if num_heads == 1:
        s = jnp.einsum("bqd,bkd->bqk", q3.astype(cdt), k3.astype(cdt),
                       preferred_element_type=f32) * inv_scale
        s = s - jnp.max(s, axis=-1, keepdims=True)
        p = jnp.exp(s)
        p = p / jnp.sum(p, axis=-1, keepdims=True)        # exact f32 softmax denom
        attn3 = jnp.einsum("bqk,bkd->bqd", p.astype(cdt), v3.astype(cdt),
                           preferred_element_type=f32)
        attn = attn3.reshape(n_rows, D)
    else:
        # Fold heads into the (single) einsum batch axis: (B',T,D) -> (B'*H,T,hd).
        def split_heads(t):
            t = t.reshape(block_b, seq_len, num_heads, head_dim)
            t = jnp.transpose(t, (0, 2, 1, 3))
            return t.reshape(block_b * num_heads, seq_len, head_dim)

        qh, kh, vh = split_heads(q3), split_heads(k3), split_heads(v3)
        s = jnp.einsum("bqd,bkd->bqk", qh.astype(cdt), kh.astype(cdt),
                       preferred_element_type=f32) * inv_scale
        s = s - jnp.max(s, axis=-1, keepdims=True)
        p = jnp.exp(s)
        p = p / jnp.sum(p, axis=-1, keepdims=True)
        ah = jnp.einsum("bqk,bkd->bqd", p.astype(cdt), vh.astype(cdt),
                        preferred_element_type=f32)
        ah = ah.reshape(block_b, num_heads, seq_len, head_dim)
        attn = jnp.transpose(ah, (0, 2, 1, 3)).reshape(n_rows, D)

    attn_out = jnp.dot(attn.astype(cdt), wo_ref[...],
                       preferred_element_type=f32) + bo_ref[...]

    # ---- residual + norm1 -------------------------------------------------------
    src = _layernorm(x + attn_out, g1_ref[...], be1_ref[...])
    src_c = src.astype(cdt)

    # ---- feed forward, chunked over dim_ff (never materializes full (N, F) h1) --
    ff = None
    for c0 in range(0, dim_ff, ff_chunk):
        c1 = min(c0 + ff_chunk, dim_ff)
        h1c = jnp.maximum(
            jnp.dot(src_c, w1_ref[:, c0:c1], preferred_element_type=f32)
            + b1_ref[:, c0:c1], 0.0)
        contrib = jnp.dot(h1c.astype(cdt), w2_ref[c0:c1, :],
                          preferred_element_type=f32)
        ff = contrib if ff is None else ff + contrib
    ff = ff + b2_ref[...]

    # ---- residual + norm2 (write the carried activation / final output) --------
    o_ref[...] = _layernorm(src + ff, g2_ref[...], be2_ref[...])


# --------------------------------- wrapper ---------------------------------------


def _auto_batch_tiles(B):
    """2 on 2-TensorCore chips (v7x) so the 'parallel' axis feeds both cores."""
    try:
        kind = jax.devices()[0].device_kind.lower()
    except Exception:
        return 1
    if "v7" in kind and B % 2 == 0:
        return 2
    return 1


def custom_transformer_encoder(params, src, num_heads, *, batch_tiles=None,
                               ff_chunk=512, compute_dtype=jnp.float32):
    """Forward of CustomTransformerEncoder (eval mode, mask=None)."""
    B, T, D = src.shape
    num_layers = params["wq"].shape[0]
    dim_ff = params["w1"].shape[-1]
    assert D % num_heads == 0
    if batch_tiles is None:
        batch_tiles = _auto_batch_tiles(B)
    assert B % batch_tiles == 0
    block_b = B // batch_tiles
    N = block_b * T
    head_dim = D // num_heads
    ff_chunk = min(ff_chunk, dim_ff)

    x2 = src.reshape(B * T, D).astype(jnp.float32)

    # Fuse Q/K/V weights once, outside the kernel.
    wqkv = jnp.concatenate([params["wq"], params["wk"], params["wv"]],
                           axis=-1).astype(compute_dtype)          # (L, D, 3D)
    bqkv = jnp.concatenate([params["bq"], params["bk"], params["bv"]],
                           axis=-1).astype(jnp.float32)            # (L, 1, 3D)
    weight_args = [
        wqkv, bqkv,
        params["wo"].astype(compute_dtype), params["bo"],
        params["w1"].astype(compute_dtype), params["b1"],
        params["w2"].astype(compute_dtype), params["b2"],
        params["g1"], params["be1"], params["g2"], params["be2"],
    ]

    def weight_spec(arr):
        nd = arr.ndim
        # Leading (layer) dim squeezed; block index follows the layer grid axis.
        return pl.BlockSpec((None,) + arr.shape[1:],
                            lambda b, l, _nd=nd: (l,) + (0,) * (_nd - 1))

    row_spec = pl.BlockSpec((N, D), lambda b, l: (b, 0))

    kernel = functools.partial(
        encoder_stack_kernel, block_b=block_b, seq_len=T, num_heads=num_heads,
        head_dim=head_dim, dim_ff=dim_ff, ff_chunk=ff_chunk,
        compute_dtype=compute_dtype)

    # ---- cost estimate (advisory) ----------------------------------------------
    flops = num_layers * (
        2 * B * T * D * 3 * D           # fused qkv projection
        + 2 * B * T * D * D             # output projection
        + 2 * 2 * B * T * D * dim_ff    # feed-forward
        + 2 * 2 * B * T * T * D)        # scores + attn @ V (summed over heads)
    transcendentals = num_layers * (num_heads * B * T * T + 2 * B * T)
    w_itemsize = jnp.dtype(compute_dtype).itemsize
    per_layer_w_bytes = w_itemsize * (3 * D * D + D * D + 2 * D * dim_ff)
    per_layer_small_bytes = 4 * (3 * D + D + dim_ff + 5 * D)
    bytes_accessed = (4 * 2 * B * T * D
                      + batch_tiles * num_layers
                      * (per_layer_w_bytes + per_layer_small_bytes))

    # ---- explicit VMEM budget: 2x streamed weights + activation blocks + temps --
    act_block = 4 * N * D
    live_tmp = 4 * (N * 3 * D                       # qkv
                    + 3 * N * D                     # q/k/v views, attn, src
                    + block_b * num_heads * T * T   # scores
                    + N * ff_chunk                  # h1 chunk
                    + 2 * N * D)                    # ff accumulator + slack
    vmem_need = (2 * (per_layer_w_bytes + per_layer_small_bytes)
                 + 4 * act_block + live_tmp)
    vmem_limit = int(min(max(2 * vmem_need, 32 * 1024 * 1024), 100 * 1024 * 1024))

    out = pl.pallas_call(
        kernel,
        out_shape=jax.ShapeDtypeStruct((B * T, D), jnp.float32),
        grid=(batch_tiles, num_layers),              # layer (carry) axis innermost
        in_specs=[row_spec] + [weight_spec(a) for a in weight_args],
        out_specs=pl.BlockSpec((N, D), lambda b, l: (b, 0)),
        compiler_params=pltpu.CompilerParams(
            dimension_semantics=("parallel", "arbitrary"),
            vmem_limit_bytes=vmem_limit),
        cost_estimate=pl.CostEstimate(flops=int(flops),
                                      transcendentals=int(transcendentals),
                                      bytes_accessed=int(bytes_accessed)),
    )(x2, *weight_args)
    return out.reshape(B, T, D)


# --------------------------- params / reference ----------------------------------


def init_params(key, d_model, num_layers, dim_ff=None):
    if dim_ff is None:
        dim_ff = 4 * d_model
    L, D, F = num_layers, d_model, dim_ff
    ks = jax.random.split(key, 16)

    def rnd(k, shape, scale):
        return scale * jax.random.normal(k, shape, jnp.float32)

    return {
        "wq": rnd(ks[0], (L, D, D), 0.1),  "bq": rnd(ks[1], (L, 1, D), 0.02),
        "wk": rnd(ks[2], (L, D, D), 0.1),  "bk": rnd(ks[3], (L, 1, D), 0.02),
        "wv": rnd(ks[4], (L, D, D), 0.1),  "bv": rnd(ks[5], (L, 1, D), 0.02),
        "wo": rnd(ks[6], (L, D, D), 0.1),  "bo": rnd(ks[7], (L, 1, D), 0.02),
        "w1": rnd(ks[8], (L, D, F), 0.1),  "b1": rnd(ks[9], (L, 1, F), 0.02),
        "w2": rnd(ks[10], (L, F, D), 0.1), "b2": rnd(ks[11], (L, 1, D), 0.02),
        "g1": 1.0 + rnd(ks[12], (L, 1, D), 0.05), "be1": rnd(ks[13], (L, 1, D), 0.02),
        "g2": 1.0 + rnd(ks[14], (L, 1, D), 0.05), "be2": rnd(ks[15], (L, 1, D), 0.02),
    }


def reference_forward(params, src, num_heads):
    """Pure-JAX reference of the PyTorch forward (eval mode, mask=None)."""
    def ln(t, g, b, eps=1e-5):
        m = jnp.mean(t, -1, keepdims=True)
        v = jnp.mean((t - m) ** 2, -1, keepdims=True)
        return (t - m) / jnp.sqrt(v + eps) * g + b

    h = src
    B, T, D = h.shape
    hd = D // num_heads
    num_layers = params["wq"].shape[0]
    for l in range(num_layers):
        p = {name: params[name][l] for name in _REF_PARAM_ORDER}
        q = (h @ p["wq"] + p["bq"]).reshape(B, T, num_heads, hd).transpose(0, 2, 1, 3)
        k = (h @ p["wk"] + p["bk"]).reshape(B, T, num_heads, hd).transpose(0, 2, 1, 3)
        v = (h @ p["wv"] + p["bv"]).reshape(B, T, num_heads, hd).transpose(0, 2, 1, 3)
        s = jnp.einsum("bhqd,bhkd->bhqk", q, k) / math.sqrt(hd)
        w = jax.nn.softmax(s, axis=-1)
        a = jnp.einsum("bhqk,bhkd->bhqd", w, v).transpose(0, 2, 1, 3).reshape(B, T, D)
        a = a @ p["wo"] + p["bo"]
        h = ln(h + a, p["g1"], p["be1"])
        ff = jnp.maximum(h @ p["w1"] + p["b1"], 0.0) @ p["w2"] + p["b2"]
        h = ln(h + ff, p["g2"], p["be2"])
    return h


# ----------------------------------- main ----------------------------------------

if __name__ == "__main__":
    batch, seq_len, d_model = 2, 8, 32
    num_layers, num_heads = 2, 1

    key = jax.random.PRNGKey(0)
    kp, kx = jax.random.split(key)
    params = init_params(kp, d_model, num_layers)
    src = jax.random.normal(kx, (batch, seq_len, d_model), jnp.float32)

    out = custom_transformer_encoder(params, src, num_heads)
    out = jax.block_until_ready(out)

    with jax.default_matmul_precision("highest"):
        ref = reference_forward(params, src, num_heads)
    ref = jax.block_until_ready(ref)

    assert out.shape == (batch, seq_len, d_model)
    # Tolerance 1e-3: in-kernel MXU matmul precision differs from the "highest"
    # XLA reference; outputs are O(1) after layernorm so this is still a tight check.
    np.testing.assert_allclose(np.asarray(out), np.asarray(ref),
                               rtol=1e-3, atol=1e-3)

    print("KERNEL_OK")
</pallas_src>

<mosaic_0001>
module attributes {stable_mosaic.version = 11 : i64} {
  func.func @encoder_stack_kernel(%arg0: i32, %arg1: i32, %arg2: memref<16x32xf32, #tpu.memory_space<vmem>>, %arg3: memref<1x32x96xf32, #tpu.memory_space<vmem>>, %arg4: memref<1x1x96xf32, #tpu.memory_space<vmem>>, %arg5: memref<1x32x32xf32, #tpu.memory_space<vmem>>, %arg6: memref<1x1x32xf32, #tpu.memory_space<vmem>>, %arg7: memref<1x32x128xf32, #tpu.memory_space<vmem>>, %arg8: memref<1x1x128xf32, #tpu.memory_space<vmem>>, %arg9: memref<1x128x32xf32, #tpu.memory_space<vmem>>, %arg10: memref<1x1x32xf32, #tpu.memory_space<vmem>>, %arg11: memref<1x1x32xf32, #tpu.memory_space<vmem>>, %arg12: memref<1x1x32xf32, #tpu.memory_space<vmem>>, %arg13: memref<1x1x32xf32, #tpu.memory_space<vmem>>, %arg14: memref<1x1x32xf32, #tpu.memory_space<vmem>>, %arg15: memref<16x32xf32, #tpu.memory_space<vmem>>) attributes {dimension_semantics = [#tpu.dimension_semantics<parallel>, #tpu.dimension_semantics<arbitrary>], iteration_bounds = array<i64: 1, 2>, scalar_prefetch = 0 : i64, scratch_operands = 0 : i64, tpu.core_type = #tpu.core_type<tc>, window_params = [{transform_indices = @transform_0, window_bounds = array<i64: 16, 32>}, {transform_indices = @transform_1, window_bounds = array<i64: 1, 32, 96>}, {transform_indices = @transform_2, window_bounds = array<i64: 1, 1, 96>}, {transform_indices = @transform_3, window_bounds = array<i64: 1, 32, 32>}, {transform_indices = @transform_4, window_bounds = array<i64: 1, 1, 32>}, {transform_indices = @transform_5, window_bounds = array<i64: 1, 32, 128>}, {transform_indices = @transform_6, window_bounds = array<i64: 1, 1, 128>}, {transform_indices = @transform_7, window_bounds = array<i64: 1, 128, 32>}, {transform_indices = @transform_8, window_bounds = array<i64: 1, 1, 32>}, {transform_indices = @transform_9, window_bounds = array<i64: 1, 1, 32>}, {transform_indices = @transform_10, window_bounds = array<i64: 1, 1, 32>}, {transform_indices = @transform_11, window_bounds = array<i64: 1, 1, 32>}, {transform_indices = @transform_12, window_bounds = array<i64: 1, 1, 32>}, {transform_indices = @transform_13, window_bounds = array<i64: 16, 32>}]} {
    %c0_i32 = arith.constant 0 : i32
    %0 = arith.cmpi eq, %arg1, %c0_i32 : i32
    %1 = arith.extui %0 : i1 to i32
    %c0_i32_0 = arith.constant 0 : i32
    %2 = arith.cmpi ne, %1, %c0_i32_0 : i32
    scf.if %2 {
      %c0_59 = arith.constant 0 : index
      %c0_60 = arith.constant 0 : index
      %109 = vector.load %arg2[%c0_59, %c0_60] : memref<16x32xf32, #tpu.memory_space<vmem>>, vector<16x32xf32>
      %c0_61 = arith.constant 0 : index
      %c0_62 = arith.constant 0 : index
      %110 = vector.load %arg15[%c0_61, %c0_62] : memref<16x32xf32, #tpu.memory_space<vmem>>, vector<16x32xf32>
      tpu.vector_store %arg15[%c0_61, %c0_62], %109 {strides = array<i32>} : memref<16x32xf32, #tpu.memory_space<vmem>>, vector<16x32xf32>,
    } else {
    }
    %c0 = arith.constant 0 : index
    %c0_1 = arith.constant 0 : index
    %3 = vector.load %arg15[%c0, %c0_1] : memref<16x32xf32, #tpu.memory_space<vmem>>, vector<16x32xf32>
    %c0_2 = arith.constant 0 : index
    %c0_3 = arith.constant 0 : index
    %c0_4 = arith.constant 0 : index
    %4 = vector.load %arg3[%c0_2, %c0_3, %c0_4] : memref<1x32x96xf32, #tpu.memory_space<vmem>>, vector<1x32x96xf32>
    %5 = vector.shape_cast %4 : vector<1x32x96xf32> to vector<32x96xf32>
    %cst = arith.constant dense<0.000000e+00> : vector<16x96xf32>
    %6 = tpu.matmul %3, %5, %cst {dimension_numbers = #tpu.dot_dimension_numbers<[1], [0], [0], [1], [0, 0, 1, 1], [], []>} : vector<16x32xf32>, vector<32x96xf32>, vector<16x96xf32> -> vector<16x96xf32>
    %c0_5 = arith.constant 0 : index
    %c0_6 = arith.constant 0 : index
    %c0_7 = arith.constant 0 : index
    %7 = vector.load %arg4[%c0_5, %c0_6, %c0_7] : memref<1x1x96xf32, #tpu.memory_space<vmem>>, vector<1x1x96xf32>
    %8 = vector.shape_cast %7 : vector<1x1x96xf32> to vector<1x96xf32>
    %9 = vector.broadcast %8 : vector<1x96xf32> to vector<16x96xf32>
    %10 = arith.addf %6, %9 : vector<16x96xf32>
    %11 = vector.extract_strided_slice %10 {offsets = [0, 0], sizes = [16, 32], strides = [1, 1]} : vector<16x96xf32> to vector<16x32xf32>
    %12 = vector.extract_strided_slice %10 {offsets = [0, 32], sizes = [16, 32], strides = [1, 1]} : vector<16x96xf32> to vector<16x32xf32>
    %13 = vector.extract_strided_slice %10 {offsets = [0, 64], sizes = [16, 32], strides = [1, 1]} : vector<16x96xf32> to vector<16x32xf32>
    %14 = vector.shape_cast %11 : vector<16x32xf32> to vector<2x8x32xf32>
    %15 = vector.shape_cast %12 : vector<16x32xf32> to vector<2x8x32xf32>
    %16 = vector.shape_cast %13 : vector<16x32xf32> to vector<2x8x32xf32>
    "tpu.trace_start"() <{level = 10 : i32, message = "bqd,bkd->bqk"}> : () -> ()
    %cst_8 = arith.constant dense<0.000000e+00> : vector<2x8x8xf32>
    %17 = tpu.matmul %14, %15, %cst_8 {dimension_numbers = #tpu.dot_dimension_numbers<[2], [2], [1], [1], [0, 0, 0, 1, 1, 1], [0], [0]>} : vector<2x8x32xf32>, vector<2x8x32xf32>, vector<2x8x8xf32> -> vector<2x8x8xf32>
    "tpu.trace_stop"() : () -> ()
    %cst_9 = arith.constant 0.176776692 : f32
    %18 = vector.broadcast %cst_9 : f32 to vector<2x8x8xf32>
    %19 = arith.mulf %17, %18 : vector<2x8x8xf32>
    %cst_10 = arith.constant dense<0xFF800000> : vector<2x8xf32>
    %20 = vector.multi_reduction <maximumf>, %19, %cst_10 [2] : vector<2x8x8xf32> to vector<2x8xf32>
    %21 = vector.shape_cast %20 : vector<2x8xf32> to vector<2x8x1xf32>
    %22 = vector.broadcast %21 : vector<2x8x1xf32> to vector<2x8x8xf32>
    %23 = arith.subf %19, %22 : vector<2x8x8xf32>
    %24 = math.exp %23 : vector<2x8x8xf32>
    %cst_11 = arith.constant dense<0.000000e+00> : vector<2x8xf32>
    %25 = vector.multi_reduction <add>, %24, %cst_11 [2] : vector<2x8x8xf32> to vector<2x8xf32>
    %26 = vector.shape_cast %25 : vector<2x8xf32> to vector<2x8x1xf32>
    %27 = vector.broadcast %26 : vector<2x8x1xf32> to vector<2x8x8xf32>
    %28 = arith.divf %24, %27 : vector<2x8x8xf32>
    "tpu.trace_start"() <{level = 10 : i32, message = "bqk,bkd->bqd"}> : () -> ()
    %cst_12 = arith.constant dense<0.000000e+00> : vector<2x8x32xf32>
    %29 = tpu.matmul %28, %16, %cst_12 {dimension_numbers = #tpu.dot_dimension_numbers<[2], [1], [1], [2], [0, 0, 0, 1, 1, 2], [0], [0]>} : vector<2x8x8xf32>, vector<2x8x32xf32>, vector<2x8x32xf32> -> vector<2x8x32xf32>
    "tpu.trace_stop"() : () -> ()
    %30 = vector.shape_cast %29 : vector<2x8x32xf32> to vector<16x32xf32>
    %c0_13 = arith.constant 0 : index
    %c0_14 = arith.constant 0 : index
    %c0_15 = arith.constant 0 : index
    %31 = vector.load %arg5[%c0_13, %c0_14, %c0_15] : memref<1x32x32xf32, #tpu.memory_space<vmem>>, vector<1x32x32xf32>
    %32 = vector.shape_cast %31 : vector<1x32x32xf32> to vector<32x32xf32>
    %cst_16 = arith.constant dense<0.000000e+00> : vector<16x32xf32>
    %33 = tpu.matmul %30, %32, %cst_16 {dimension_numbers = #tpu.dot_dimension_numbers<[1], [0], [0], [1], [0, 0, 1, 1], [], []>} : vector<16x32xf32>, vector<32x32xf32>, vector<16x32xf32> -> vector<16x32xf32>
    %c0_17 = arith.constant 0 : index
    %c0_18 = arith.constant 0 : index
    %c0_19 = arith.constant 0 : index
    %34 = vector.load %arg6[%c0_17, %c0_18, %c0_19] : memref<1x1x32xf32, #tpu.memory_space<vmem>>, vector<1x1x32xf32>
    %35 = vector.shape_cast %34 : vector<1x1x32xf32> to vector<1x32xf32>
    %36 = vector.broadcast %35 : vector<1x32xf32> to vector<16x32xf32>
    %37 = arith.addf %33, %36 : vector<16x32xf32>
    %38 = arith.addf %3, %37 : vector<16x32xf32>
    %c0_20 = arith.constant 0 : index
    %c0_21 = arith.constant 0 : index
    %c0_22 = arith.constant 0 : index
    %39 = vector.load %arg11[%c0_20, %c0_21, %c0_22] : memref<1x1x32xf32, #tpu.memory_space<vmem>>, vector<1x1x32xf32>
    %40 = vector.shape_cast %39 : vector<1x1x32xf32> to vector<1x32xf32>
    %c0_23 = arith.constant 0 : index
    %c0_24 = arith.constant 0 : index
    %c0_25 = arith.constant 0 : index
    %41 = vector.load %arg12[%c0_23, %c0_24, %c0_25] : memref<1x1x32xf32, #tpu.memory_space<vmem>>, vector<1x1x32xf32>
    %42 = vector.shape_cast %41 : vector<1x1x32xf32> to vector<1x32xf32>
    %cst_26 = arith.constant dense<0.000000e+00> : vector<16xf32>
    %43 = vector.multi_reduction <add>, %38, %cst_26 [1] : vector<16x32xf32> to vector<16xf32>
    %44 = vector.shape_cast %43 : vector<16xf32> to vector<16x1xf32>
    %cst_27 = arith.constant 3.200000e+01 : f32
    %45 = vector.broadcast %cst_27 : f32 to vector<16x1xf32>
    %46 = arith.divf %44, %45 : vector<16x1xf32>
    %47 = vector.broadcast %46 : vector<16x1xf32> to vector<16x32xf32>
    %48 = arith.subf %38, %47 : vector<16x32xf32>
    %49 = arith.mulf %48, %48 : vector<16x32xf32>
    %cst_28 = arith.constant dense<0.000000e+00> : vector<16xf32>
    %50 = vector.multi_reduction <add>, %49, %cst_28 [1] : vector<16x32xf32> to vector<16xf32>
    %51 = vector.shape_cast %50 : vector<16xf32> to vector<16x1xf32>
    %cst_29 = arith.constant 3.200000e+01 : f32
    %52 = vector.broadcast %cst_29 : f32 to vector<16x1xf32>
    %53 = arith.divf %51, %52 : vector<16x1xf32>
    %54 = vector.broadcast %46 : vector<16x1xf32> to vector<16x32xf32>
    %55 = arith.subf %38, %54 : vector<16x32xf32>
    %cst_30 = arith.constant 9.99999974E-6 : f32
    %56 = vector.broadcast %cst_30 : f32 to vector<16x1xf32>
    %57 = arith.addf %53, %56 : vector<16x1xf32>
    %58 = math.rsqrt %57 : vector<16x1xf32>
    %59 = vector.broadcast %58 : vector<16x1xf32> to vector<16x32xf32>
    %60 = arith.mulf %55, %59 : vector<16x32xf32>
    %61 = vector.broadcast %40 : vector<1x32xf32> to vector<16x32xf32>
    %62 = arith.mulf %60, %61 : vector<16x32xf32>
    %63 = vector.broadcast %42 : vector<1x32xf32> to vector<16x32xf32>
    %64 = arith.addf %62, %63 : vector<16x32xf32>
    %c0_31 = arith.constant 0 : index
    %c0_32 = arith.constant 0 : index
    %c0_33 = arith.constant 0 : index
    %65 = vector.load %arg7[%c0_31, %c0_32, %c0_33] : memref<1x32x128xf32, #tpu.memory_space<vmem>>, vector<1x32x128xf32>
    %66 = vector.shape_cast %65 : vector<1x32x128xf32> to vector<32x128xf32>
    %cst_34 = arith.constant dense<0.000000e+00> : vector<16x128xf32>
    %67 = tpu.matmul %64, %66, %cst_34 {dimension_numbers = #tpu.dot_dimension_numbers<[1], [0], [0], [1], [0, 0, 1, 1], [], []>} : vector<16x32xf32>, vector<32x128xf32>, vector<16x128xf32> -> vector<16x128xf32>
    %c0_35 = arith.constant 0 : index
    %c0_36 = arith.constant 0 : index
    %c0_37 = arith.constant 0 : index
    %68 = vector.load %arg8[%c0_35, %c0_36, %c0_37] : memref<1x1x128xf32, #tpu.memory_space<vmem>>, vector<1x1x128xf32>
    %69 = vector.shape_cast %68 : vector<1x1x128xf32> to vector<1x128xf32>
    %70 = vector.broadcast %69 : vector<1x128xf32> to vector<16x128xf32>
    %71 = arith.addf %67, %70 : vector<16x128xf32>
    %cst_38 = arith.constant 0.000000e+00 : f32
    %72 = vector.broadcast %cst_38 : f32 to vector<16x128xf32>
    %73 = arith.maximumf %71, %72 : vector<16x128xf32>
    %c0_39 = arith.constant 0 : index
    %c0_40 = arith.constant 0 : index
    %c0_41 = arith.constant 0 : index
    %74 = vector.load %arg9[%c0_39, %c0_40, %c0_41] : memref<1x128x32xf32, #tpu.memory_space<vmem>>, vector<1x128x32xf32>
    %75 = vector.shape_cast %74 : vector<1x128x32xf32> to vector<128x32xf32>
    %cst_42 = arith.constant dense<0.000000e+00> : vector<16x32xf32>
    %76 = tpu.matmul %73, %75, %cst_42 {dimension_numbers = #tpu.dot_dimension_numbers<[1], [0], [0], [1], [0, 0, 1, 1], [], []>} : vector<16x128xf32>, vector<128x32xf32>, vector<16x32xf32> -> vector<16x32xf32>
    %c0_43 = arith.constant 0 : index
    %c0_44 = arith.constant 0 : index
    %c0_45 = arith.constant 0 : index
    %77 = vector.load %arg10[%c0_43, %c0_44, %c0_45] : memref<1x1x32xf32, #tpu.memory_space<vmem>>, vector<1x1x32xf32>
    %78 = vector.shape_cast %77 : vector<1x1x32xf32> to vector<1x32xf32>
    %79 = vector.broadcast %78 : vector<1x32xf32> to vector<16x32xf32>
    %80 = arith.addf %76, %79 : vector<16x32xf32>
    %81 = arith.addf %64, %80 : vector<16x32xf32>
    %c0_46 = arith.constant 0 : index
    %c0_47 = arith.constant 0 : index
    %c0_48 = arith.constant 0 : index
    %82 = vector.load %arg13[%c0_46, %c0_47, %c0_48] : memref<1x1x32xf32, #tpu.memory_space<vmem>>, vector<1x1x32xf32>
    %83 = vector.shape_cast %82 : vector<1x1x32xf32> to vector<1x32xf32>
    %c0_49 = arith.constant 0 : index
    %c0_50 = arith.constant 0 : index
    %c0_51 = arith.constant 0 : index
    %84 = vector.load %arg14[%c0_49, %c0_50, %c0_51] : memref<1x1x32xf32, #tpu.memory_space<vmem>>, vector<1x1x32xf32>
    %85 = vector.shape_cast %84 : vector<1x1x32xf32> to vector<1x32xf32>
    %cst_52 = arith.constant dense<0.000000e+00> : vector<16xf32>
    %86 = vector.multi_reduction <add>, %81, %cst_52 [1] : vector<16x32xf32> to vector<16xf32>
    %87 = vector.shape_cast %86 : vector<16xf32> to vector<16x1xf32>
    %cst_53 = arith.constant 3.200000e+01 : f32
    %88 = vector.broadcast %cst_53 : f32 to vector<16x1xf32>
    %89 = arith.divf %87, %88 : vector<16x1xf32>
    %90 = vector.broadcast %89 : vector<16x1xf32> to vector<16x32xf32>
    %91 = arith.subf %81, %90 : vector<16x32xf32>
    %92 = arith.mulf %91, %91 : vector<16x32xf32>
    %cst_54 = arith.constant dense<0.000000e+00> : vector<16xf32>
    %93 = vector.multi_reduction <add>, %92, %cst_54 [1] : vector<16x32xf32> to vector<16xf32>
    %94 = vector.shape_cast %93 : vector<16xf32> to vector<16x1xf32>
    %cst_55 = arith.constant 3.200000e+01 : f32
    %95 = vector.broadcast %cst_55 : f32 to vector<16x1xf32>
    %96 = arith.divf %94, %95 : vector<16x1xf32>
    %97 = vector.broadcast %89 : vector<16x1xf32> to vector<16x32xf32>
    %98 = arith.subf %81, %97 : vector<16x32xf32>
    %cst_56 = arith.constant 9.99999974E-6 : f32
    %99 = vector.broadcast %cst_56 : f32 to vector<16x1xf32>
    %100 = arith.addf %96, %99 : vector<16x1xf32>
    %101 = math.rsqrt %100 : vector<16x1xf32>
    %102 = vector.broadcast %101 : vector<16x1xf32> to vector<16x32xf32>
    %103 = arith.mulf %98, %102 : vector<16x32xf32>
    %104 = vector.broadcast %83 : vector<1x32xf32> to vector<16x32xf32>
    %105 = arith.mulf %103, %104 : vector<16x32xf32>
    %106 = vector.broadcast %85 : vector<1x32xf32> to vector<16x32xf32>
    %107 = arith.addf %105, %106 : vector<16x32xf32>
    %c0_57 = arith.constant 0 : index
    %c0_58 = arith.constant 0 : index
    %108 = vector.load %arg15[%c0_57, %c0_58] : memref<16x32xf32, #tpu.memory_space<vmem>>, vector<16x32xf32>
    tpu.vector_store %arg15[%c0_57, %c0_58], %107 {strides = array<i32>} : memref<16x32xf32, #tpu.memory_space<vmem>>, vector<16x32xf32>,
    return
  }
  func.func @transform_0(%arg0: i32, %arg1: i32) -> (i32, i32) {
    %c0_i32 = arith.constant 0 : i32
    %c0_i32_0 = arith.constant 0 : i32
    return %arg0, %c0_i32 : i32, i32
  }
  func.func @transform_1(%arg0: i32, %arg1: i32) -> (i32, i32, i32) {
    %c0_i32 = arith.constant 0 : i32
    %c0_i32_0 = arith.constant 0 : i32
    %c0_i32_1 = arith.constant 0 : i32
    return %arg1, %c0_i32, %c0_i32_0 : i32, i32, i32
  }
  func.func @transform_2(%arg0: i32, %arg1: i32) -> (i32, i32, i32) {
    %c0_i32 = arith.constant 0 : i32
    %c0_i32_0 = arith.constant 0 : i32
    %c0_i32_1 = arith.constant 0 : i32
    return %arg1, %c0_i32, %c0_i32_0 : i32, i32, i32
  }
  func.func @transform_3(%arg0: i32, %arg1: i32) -> (i32, i32, i32) {
    %c0_i32 = arith.constant 0 : i32
    %c0_i32_0 = arith.constant 0 : i32
    %c0_i32_1 = arith.constant 0 : i32
    return %arg1, %c0_i32, %c0_i32_0 : i32, i32, i32
  }
  func.func @transform_4(%arg0: i32, %arg1: i32) -> (i32, i32, i32) {
    %c0_i32 = arith.constant 0 : i32
    %c0_i32_0 = arith.constant 0 : i32
    %c0_i32_1 = arith.constant 0 : i32
    return %arg1, %c0_i32, %c0_i32_0 : i32, i32, i32
  }
  func.func @transform_5(%arg0: i32, %arg1: i32) -> (i32, i32, i32) {
    %c0_i32 = arith.constant 0 : i32
    %c0_i32_0 = arith.constant 0 : i32
    %c0_i32_1 = arith.constant 0 : i32
    return %arg1, %c0_i32, %c0_i32_0 : i32, i32, i32
  }
  func.func @transform_6(%arg0: i32, %arg1: i32) -> (i32, i32, i32) {
    %c0_i32 = arith.constant 0 : i32
    %c0_i32_0 = arith.constant 0 : i32
    %c0_i32_1 = arith.constant 0 : i32
    return %arg1, %c0_i32, %c0_i32_0 : i32, i32, i32
  }
  func.func @transform_7(%arg0: i32, %arg1: i32) -> (i32, i32, i32) {
    %c0_i32 = arith.constant 0 : i32
    %c0_i32_0 = arith.constant 0 : i32
    %c0_i32_1 = arith.constant 0 : i32
    return %arg1, %c0_i32, %c0_i32_0 : i32, i32, i32
  }
  func.func @transform_8(%arg0: i32, %arg1: i32) -> (i32, i32, i32) {
    %c0_i32 = arith.constant 0 : i32
    %c0_i32_0 = arith.constant 0 : i32
    %c0_i32_1 = arith.constant 0 : i32
    return %arg1, %c0_i32, %c0_i32_0 : i32, i32, i32
  }
  func.func @transform_9(%arg0: i32, %arg1: i32) -> (i32, i32, i32) {
    %c0_i32 = arith.constant 0 : i32
    %c0_i32_0 = arith.constant 0 : i32
    %c0_i32_1 = arith.constant 0 : i32
    return %arg1, %c0_i32, %c0_i32_0 : i32, i32, i32
  }
  func.func @transform_10(%arg0: i32, %arg1: i32) -> (i32, i32, i32) {
    %c0_i32 = arith.constant 0 : i32
    %c0_i32_0 = arith.constant 0 : i32
    %c0_i32_1 = arith.constant 0 : i32
    return %arg1, %c0_i32, %c0_i32_0 : i32, i32, i32
  }
  func.func @transform_11(%arg0: i32, %arg1: i32) -> (i32, i32, i32) {
    %c0_i32 = arith.constant 0 : i32
    %c0_i32_0 = arith.constant 0 : i32
    %c0_i32_1 = arith.constant 0 : i32
    return %arg1, %c0_i32, %c0_i32_0 : i32, i32, i32
  }
  func.func @transform_12(%arg0: i32, %arg1: i32) -> (i32, i32, i32) {
    %c0_i32 = arith.constant 0 : i32
    %c0_i32_0 = arith.constant 0 : i32
    %c0_i32_1 = arith.constant 0 : i32
    return %arg1, %c0_i32, %c0_i32_0 : i32, i32, i32
  }
  func.func @transform_13(%arg0: i32, %arg1: i32) -> (i32, i32) {
    %c0_i32 = arith.constant 0 : i32
    %c0_i32_0 = arith.constant 0 : i32
    return %arg0, %c0_i32 : i32, i32
  }
}

</mosaic_0001>

<bundles_post_ra>
// kernel: tpu_custom_call.1
= control target key start
LH: loop header
LB: loop body
LE: loop exit
PB: predicated region body
PF: predicated region fallthrough
CT: control target
= control target key end

     0   :  { %s1710_s0 = inlined_call_operand.vmem [shape: f32[16,32], index: 0, kind: input, shape index: {}]   ;;  %s1711_s1 = inlined_call_operand.vmem [shape: f32[2,32,96], index: 1, kind: input, shape index: {}]   ;;  %s1712_s2 = inlined_call_operand.vmem [shape: f32[2,1,96], index: 2, kind: input, shape index: {}]   ;;  %s1713_s3 = inlined_call_operand.vmem [shape: f32[2,32,32], index: 3, kind: input, shape index: {}]   ;;  %s1714_s4 = inlined_call_operand.vmem [shape: f32[2,1,32], index: 4, kind: input, shape index: {}]   ;;  %s1715_s5 = inlined_call_operand.vmem [shape: f32[2,32,128], index: 5, kind: input, shape index: {}]   ;;  %s1716_s6 = inlined_call_operand.vmem [shape: f32[2,1,128], index: 6, kind: input, shape index: {}]   ;;  %s1717_s7 = inlined_call_operand.vmem [shape: f32[2,128,32], index: 7, kind: input, shape index: {}]   ;;  %s1718_s8 = inlined_call_operand.vmem [shape: f32[2,1,32], index: 8, kind: input, shape index: {}]   ;;  %s1719_s9 = inlined_call_operand.vmem [shape: f32[2,1,32], index: 9, kind: input, shape index: {}]   ;;  %s1720_s10 = inlined_call_operand.vmem [shape: f32[2,1,32], index: 10, kind: input, shape index: {}]   ;;  %s1721_s11 = inlined_call_operand.vmem [shape: f32[2,1,32], index: 11, kind: input, shape index: {}]   ;;  %s1722_s12 = inlined_call_operand.vmem [shape: f32[2,1,32], index: 12, kind: input, shape index: {}]   ;;  %s1723_s13 = inlined_call_operand.hbm [shape: f32[16,32], index: 13, kind: output, shape index: {}]  }
   0x1   :  { %1726 = sst [smem:[#allocation8_spill]] %s1711_s1 }
   0x2   :  { %1727 = sst [smem:[#allocation9_spill]] %s1713_s3 }
   0x3   :  { %1728 = sst [smem:[#allocation10_spill]] %s1715_s5 }
   0x4   :  { %1729 = sst [smem:[#allocation11_spill]] %s1716_s6 }
   0x5   :  { %1730 = sst [smem:[#allocation12_spill]] %s1723_s13 }
   0x6   :  { %18 = vsyncpa [#allocation3], 0  ;;  %s1504_s25 = smov 0   ;;  %s1506_s26 = smov 0  }
   0x7   :  { %s1508_s27 = smov 0  }
   0x8 LB: > { %1731 = sst [smem:[#allocation5_spill]] %s1422_s26  ;;  %s33_s29 = sadd.s32 1, %s1422_s26  ;;  %s1426_s27 = sphi %s1508_s27, %s24_s27   ;;  %s1422_s26 = sphi %s1506_s26, %s1747_s26   ;;  %s1418_s25 = sphi %s1504_s25, %s1746_s25  }
   0x9   : > { %1732 = sst [smem:[#allocation6_spill]] %s1426_s27  ;;  %p34_p0 = scmp.ge.s32.totalorder %s33_s29, 2 }
   0xa   : > { %p1280_p1 = scmp.ge.s32.totalorder %s1426_s27, 1  ;;  %p505_p2 = scmp.lt.s32.totalorder %s1426_s27, 3 }
   0xb   : > { %s1749_s29 = smov (%p34_p0, %s33_s29), 0 }
   0xc   : > { %1733 = sst [smem:[#allocation7_spill]] %s1749_s29  ;;  %p506_p3 = pnand %p1280_p1, %p505_p2 }
   0xd   : > { %p594_p4 = scmp.lt.s32.totalorder (!%p506_p3), %s1418_s25, 1  ;;  %s1734_s1 = sld [smem:[#allocation8_spill]] (!%p506_p3) }
   0xe   : > { %509 = sbr.rel (%p506_p3) target bundleno = 1768 (0x6e8), region = 72  ;;  %s1735_s3 = sld [smem:[#allocation9_spill]] (!%p506_p3) }
   0xf   : > { %s1736_s5 = sld [smem:[#allocation10_spill]] (!%p506_p3)  ;;  %p1289_p5 = scmp.ne.s32.totalorder (!%p506_p3), %s1418_s25, 0 }
  0x13   : > { %s1523_s30 = scalar_select %p594_p4, %s1418_s25, 1 }
  0x15   : > { %s1306_s14 = sshll.u32 %s1523_s30, 5  ;;  %s1309_s18 = sshll.u32 %s1523_s30, 7 }
  0x16   : > { %s598_s20 = scalar_lea.vmem %s1734_s1, %s1306_s14  ;;  %s1536_s23 = scalar_lea.vmem %s1735_s3, %s1306_s14 }
  0x17   : > { %s1545_s27 = scalar_lea.vmem %s1736_s5, %s1306_s14  ;;  %s1555_s21 = scalar_lea.vmem %s1717_s7, %s1309_s18 }
  0x18   : > { %s625_s28 = scalar_lea.vmem %s1718_s8, %s1523_s30  ;;  %s628_s13 = scalar_lea.vmem %s1719_s9, %s1523_s30 }
  0x19   : > { %s631_s5 = scalar_lea.vmem %s1720_s10, %s1523_s30  ;;  %s634_s17 = scalar_lea.vmem %s1721_s11, %s1523_s30 }
  0x1a   : > { %s637_s18 = scalar_lea.vmem %s1722_s12, %s1523_s30  ;;  %642 = sbr.rel (%p1289_p5) target bundleno = 34 (0x22), region = 76 }
  0x1f   : > { %v643_v0 = vld [vmem:[%s1710_s0] sm:$0xff]  ;;  %vm645_vm0 = vcmask 261120   ;;  %v644_v1 = vld [vmem:[%s1710_s0 + $0x8] sm:$0xff] }
  0x20   : > { %646 = vst.msk [vmem:[#allocation2] sm:$0xff] %vm645_vm0, %v643_v0 }
  0x21   : > { %647 = vst.msk [vmem:[#allocation2 + $0x8] sm:$0xff] %vm645_vm0, %v644_v1 }
  0x22 PF: > { %v653_v2 = vld [vmem:[%s598_s20 + $0x18] sm:$0xff]  ;;  %v652_v3 = vld [vmem:[%s598_s20 + $0x10] sm:$0xff]  ;;  %v651_v4 = vld [vmem:[%s598_s20 + $0x8] sm:$0xff]  ;;  %vm658_vm1 = vcmask 261120   ;;  %s1738_s24 = scalar_lea.vmem %s1712_s2, %s1523_s30  ;;  %s1429_s26 = smov 64   ;;  %vm744_vm2 = vcmask 64512  }
  0x23   : > { %677 = vmatpush.msra.mxu3 %v653_v2  ;;  %v650_v5 = vld [vmem:[%s598_s20] sm:$0xff]  ;;  %s1428_s20 = smov 96   ;;  %v848_v34 = vld [vmem:[%s1536_s23 + $0x18] sm:$0xff]  ;;  %v847_v35 = vld [vmem:[%s1536_s23 + $0x10] sm:$0xff]  ;;  %s1739_s16 = scalar_lea.vmem %s1714_s4, %s1523_s30 }
  0x24   : > { %v1346_v8 = vld [vmem:[%s1738_s24] ss:$0 sm:$0xff]  ;;  %v846_v36 = vld [vmem:[%s1536_s23 + $0x8] sm:$0xff]  ;;  %s1740_s19 = sld [smem:[#allocation11_spill]] }
  0x25   : > { %678 = vmatpush.msra.mxu3 %v652_v3  ;;  %v845_v60 = vld [vmem:[%s1536_s23] sm:$0xff]  ;;  %s1743_s14 = sld [smem:[#allocation12_spill]]  ;;  %s1433_s23 = smov 8  }
  0x26   : > { %v1347_v63 = vld [vmem:[%s1739_s16] ss:$0 sm:$0xff] }
  0x27   : > { %679 = vmatpush.msra.mxu3 %v651_v4  ;;  %v1583_v6 = vld [vmem:[#allocation2] sm:$0xff] }
  0x28   : > { %v1587_v7 = vld [vmem:[#allocation2 + $0x8] sm:$0xff] }
  0x29   : > { %680 = vmatpush.msra.mxu3 %v650_v5 }
  0x2a   : > { %1290 = vmatmul.msk.f32.vlgmr.msra.gmra.mxu3 %vm658_vm1, %v1583_v6  ;;  %s1741_s29 = scalar_lea.vmem %s1740_s19, %s1523_s30 }
  0x2b   : > { %s1099_s15 = sshll.u32 %s1743_s14, 4  ;;  %s1100_s15 = int_to_ptr.hbm [resolvable:$true] %s1099_s15 }
  0x32   : > { %1291 = vmatmul.msk.f32.gmra.mxu3 %vm658_vm1, %v1587_v7 }
  0xad   : > { %v682_v9 = vpop.f32.mrf.mxu3 }
  0xae   : > { %v683_v10 = vadd.f32 %v1346_v8, %v682_v9 }
  0xb0   : > { %689 = vrot.lane.b32.xlu0 %v683_v10, %s1428_s20 }
  0xb5   : > { %v685_v11 = vpop.f32.mrf.mxu3 }
  0xb6   : > { %v686_v12 = vadd.f32 %v1346_v8, %v685_v11 }
  0xb8   : > { %716 = vrot.lane.b32.xlu0 %v686_v12, %s1428_s20  ;;  %s1742_s20 = sld [smem:[#allocation6_spill]] }
  0xbe   : > { %s1744_s16 = sadd.s32 4294967295, %s1742_s20  }
  0xbf   : > { %p1314_p6 = scmp.eq.s32.totalorder %s1744_s16, 1 }
  0xc0   : > { %793 = vrot.lane.b32.xlu0 %v683_v10, %s1429_s26 }
 0x122   : > { %v690_v13 = vpop.permute.xlu0 %689 }
 0x123   : > { %1292 = vmatpush.xpose.msk.msra.mxu1 %vm658_vm1, %v690_v13 }
 0x126   : > { %1293 = vmatmul.msk.f32.vlgmr.msra.gmra.mxu1 %vm658_vm1, %v683_v10  ;;  %v1430_v10 = vmov 32.0  }
 0x127   : > { %871 = vmatpush.msrb.mxu1 %v848_v34  ;;  %v1000_v34 = vld [vmem:[%s1555_s21 + $0x70] sm:$0xff] }
 0x129   : > { %872 = vmatpush.msrb.mxu1 %v847_v35 }
 0x12a   : > { %v717_v14 = vpop.permute.xlu0 %716 }
 0x12b   : > { %1294 = vmatpush.xpose.msk.msra.mxu2 %vm658_vm1, %v717_v14  ;;  %873 = vmatpush.msrb.mxu1 %v846_v36  ;;  %v999_v36 = vld [vmem:[%s1555_s21 + $0x68] sm:$0xff] }
 0x12d   : > { %874 = vmatpush.msrb.mxu1 %v845_v60  ;;  %v991_v60 = vld [vmem:[%s1555_s21 + $0x28] sm:$0xff] }
 0x12e   : > { %1295 = vmatmul.msk.f32.vlgmr.msra.gmra.mxu2 %vm658_vm1, %v686_v12 }
 0x132   : > { %v794_v15 = vpop.permute.xlu0 %793 }
 0x133   : > { %814 = vmatpush.msrb.mxu3 %v794_v15 }
 0x1a3   : > { %v712_v16 = vpop.f32.mrf.mxu1 }
 0x1a4   : > { %v742_v17 = vmul.f32 0.17677669, %v712_v16 }
 0x1a6   : > { %v745_v18 = vsel %vm744_vm2, %v742_v17, -inf }
 0x1a7   : > { %746 = vmax.xlane.f32.xlu1 %v745_v18 }
 0x1b1   : > { %v739_v19 = vpop.f32.mrf.mxu2 }
 0x1b2   : > { %v743_v20 = vmul.f32 0.17677669, %v739_v19 }
 0x1b4   : > { %v748_v21 = vsel %vm744_vm2, %v743_v20, -inf }
 0x1b5   : > { %749 = vmax.xlane.f32.xlu1 %v748_v21 }
 0x1ce   : > { %819 = vrot.lane.b32.xlu1 %v686_v12, %s1429_s26 }
 0x21a   : > { %v747_v22 = vpop.xlane.xlu1 %746 }
 0x21b   : > { %v751_v23 = vsub.f32 %v742_v17, %v747_v22 }
 0x21d   : > { %v753_v24 = vmul.f32 1.442695, %v751_v23 }
 0x21f   : > { %1354 = vpow2.f32 %v753_v24 }
 0x225   : > { %v1355_v25 = vpop.eup %1354 }
 0x226   : > { %v757_v26 = vsel %vm744_vm2, %v1355_v25, 0.0 }
 0x227   : > { %758 = vadd.xlane.f32.xlu2 %v757_v26  ;;  %v949_v26 = vld [vmem:[%s1545_s27 + $0x10] sm:$0xff] }
 0x228   : > { %v750_v27 = vpop.xlane.xlu1 %749 }
 0x229   : > { %v752_v28 = vsub.f32 %v743_v20, %v750_v27  ;;  %v948_v27 = vld [vmem:[%s1545_s27 + $0x8] sm:$0xff] }
 0x22b   : > { %v755_v29 = vmul.f32 1.442695, %v752_v28  ;;  %v947_v28 = vld [vmem:[%s1545_s27] sm:$0xff] }
 0x22d   : > { %1356 = vpow2.f32 %v755_v29 }
 0x233   : > { %v1357_v30 = vpop.eup %1356 }
 0x234   : > { %v760_v31 = vsel %vm744_vm2, %v1357_v30, 0.0 }
 0x235   : > { %761 = vadd.xlane.f32.xlu2 %v760_v31 }
 0x240   : > { %v820_v32 = vpop.permute.xlu1 %819 }
 0x241   : > { %840 = vmatpush.msra.mxu3 %v820_v32 }
 0x29a   : > { %v759_v33 = vpop.xlane.xlu2 %758 }
 0x29b   : > { %1358 = vrcp.f32 %v759_v33  ;;  %v774_v40 = vand.u32 2147483648, %v759_v33  ;;  %v772_v42 = vand.u32 2147483647, %v759_v33  ;;  %vm768_vm4 = vweird.f32 %v759_v33 }
 0x29d   : > { %v775_v45 = vor.u32 1.1754944e-38, %v774_v40  ;;  %vm773_vm6 = vcmp.eq.f32.partialorder %v772_v42, 8.507059e+37  ;;  %v998_v40 = vld [vmem:[%s1555_s21 + $0x60] sm:$0xff] }
 0x2a1   : > { %v1359_v37 = vpop.eup %1358 }
 0x2a2   : > { %v764_v38 = vmul.f32 %v1359_v37, %v759_v33  ;;  %vm769_vm3 = vweird.f32 %v1359_v37  ;;  %v1001_v33 = vld [vmem:[%s1555_s21 + $0x78] sm:$0xff] }
 0x2a3   : > { %vm770_vm5 = vmor %vm768_vm4, %vm769_vm3  ;;  %1006 = vmatpush.msra.mxu0 %v1001_v33 }
 0x2a4   : > { %v765_v39 = vsub.f32 1.0, %v764_v38 }
 0x2a5   : > { %1007 = vmatpush.msra.mxu0 %v1000_v34 }
 0x2a6   : > { %v766_v41 = vmul.f32 %v1359_v37, %v765_v39 }
 0x2a7   : > { %1008 = vmatpush.msra.mxu0 %v999_v36 }
 0x2a8   : > { %v767_v43 = vadd.f32 %v1359_v37, %v766_v41  ;;  %v762_v44 = vpop.xlane.xlu2 %761 }
 0x2a9   : > { %1360 = vrcp.f32 %v762_v44  ;;  %v789_v52 = vand.u32 2147483648, %v762_v44  ;;  %v787_v54 = vand.u32 2147483647, %v762_v44  ;;  %vm783_vm8 = vweird.f32 %v762_v44  ;;  %1009 = vmatpush.msra.mxu0 %v998_v40 }
 0x2aa   : > { %v771_v46 = vsel %vm770_vm5, %v1359_v37, %v767_v43  ;;  %1362 = vrcp.f32 %v1430_v10  ;;  %v997_v43 = vld [vmem:[%s1555_s21 + $0x58] sm:$0xff]  ;;  %v986_v10 = vld [vmem:[%s1555_s21] sm:$0xff] }
 0x2ab   : > { %v776_v47 = vsel %vm773_vm6, %v775_v45, %v771_v46  ;;  %v790_v56 = vor.u32 1.1754944e-38, %v789_v52  ;;  %vm788_vm10 = vcmp.eq.f32.partialorder %v787_v54, 8.507059e+37  ;;  %v996_v45 = vld [vmem:[%s1555_s21 + $0x50] sm:$0xff]  ;;  %1010 = vmatpush.msra.mxu0 %v997_v43  ;;  %v994_v52 = vld [vmem:[%s1555_s21 + $0x40] sm:$0xff] }
 0x2ac   : > { %v777_v48 = vmul.f32 %v1355_v25, %v776_v47  ;;  %v950_v25 = vld [vmem:[%s1545_s27 + $0x18] sm:$0xff]  ;;  %v1348_v47 = vld [vmem:[%s628_s13] ss:$0 sm:$0xff]  ;;  %s1432_s27 = smov 128  }
 0x2ad   : > { %973 = vmatpush.msrb.mxu2 %v950_v25  ;;  %1011 = vmatpush.msra.mxu0 %v996_v45 }
 0x2ae   : > { %1296 = vmatmul.msk.f32.vlgmr.msrb.gmra.mxu3 %vm744_vm2, %v777_v48  ;;  %v995_v48 = vld [vmem:[%s1555_s21 + $0x48] sm:$0xff] }
 0x2af   : > { %v1361_v49 = vpop.eup %1360  ;;  %974 = vmatpush.msrb.mxu2 %v949_v26  ;;  %1012 = vmatpush.msra.mxu0 %v995_v48  ;;  %v1352_v48 = vld [vmem:[%s634_s17] ss:$0 sm:$0xff]  ;;  %s1431_s17 = smov [#allocation2]  }
 0x2b0   : > { %v779_v50 = vmul.f32 %v1361_v49, %v762_v44  ;;  %vm784_vm7 = vweird.f32 %v1361_v49  ;;  %v1363_v11 = vpop.eup %1362  ;;  %s1097_s30 = sshll.u32 %s1431_s17, 4  ;;  %s1098_s30 = int_to_ptr.vmem [resolvable:$true] %s1097_s30 }
 0x2b1   : > { %vm785_vm9 = vmor %vm783_vm8, %vm784_vm7  ;;  %v893_v12 = vmul.f32 32.0, %v1363_v11  ;;  %vm897_vm11 = vweird.f32 %v1363_v11  ;;  %975 = vmatpush.msrb.mxu2 %v948_v27  ;;  %1013 = vmatpush.msra.mxu0 %v994_v52 }
 0x2b2   : > { %v780_v51 = vsub.f32 1.0, %v779_v50 }
 0x2b3   : > { %v894_v13 = vsub.f32 1.0, %v893_v12  ;;  %976 = vmatpush.msrb.mxu2 %v947_v28 }
 0x2b4   : > { %v781_v53 = vmul.f32 %v1361_v49, %v780_v51  ;;  %v1349_v51 = vld [vmem:[%s631_s5] ss:$0 sm:$0xff] }
 0x2b5   : > { %v895_v14 = vmul.f32 %v1363_v11, %v894_v13 }
 0x2b6   : > { %v782_v55 = vadd.f32 %v1361_v49, %v781_v53 }
 0x2b7   : > { %v896_v15 = vadd.f32 %v1363_v11, %v895_v14 }
 0x2b8   : > { %v786_v57 = vsel %vm785_vm9, %v1361_v49, %v782_v55  ;;  %v993_v55 = vld [vmem:[%s1555_s21 + $0x38] sm:$0xff] }
 0x2b9   : > { %v791_v58 = vsel %vm788_vm10, %v790_v56, %v786_v57  ;;  %1014 = vmatpush.msra.mxu0 %v993_v55 }
 0x2ba   : > { %v792_v59 = vmul.f32 %v1357_v30, %v791_v58  ;;  %v992_v58 = vld [vmem:[%s1555_s21 + $0x30] sm:$0xff] }
 0x2bb   : > { %1015 = vmatpush.msra.mxu0 %v992_v58 }
 0x2bc   : > { %1297 = vmatmul.msk.f32.vlgmr.msra.gmra.mxu3 %vm744_vm2, %v792_v59 }
 0x2bd   : > { %1016 = vmatpush.msra.mxu0 %v991_v60 }
 0x331   : > { %v816_v61 = vpop.f32.mrf.mxu3 }
 0x332   : > { %1298 = vmatmul.msk.f32.vlgmr.msrb.gmra.mxu1 %vm658_vm1, %v816_v61 }
 0x33f   : > { %v842_v62 = vpop.f32.mrf.mxu3 }
 0x340   : > { %1299 = vmatmul.msk.f32.gmra.mxu1 %vm658_vm1, %v842_v62  ;;  %v990_v62 = vld [vmem:[%s1555_s21 + $0x20] sm:$0xff] }
 0x341   : > { %1017 = vmatpush.msra.mxu0 %v990_v62 }
 0x3af   : > { %v876_v0 = vpop.f32.mrf.mxu1 }
 0x3b0   : > { %v877_v1 = vadd.f32 %v1347_v63, %v876_v0  ;;  %v989_v0 = vld [vmem:[%s1555_s21 + $0x18] sm:$0xff] }
 0x3b1   : > { %1018 = vmatpush.msra.mxu0 %v989_v0 }
 0x3b2   : > { %v882_v2 = vadd.f32 %v877_v1, %v1583_v6  ;;  %v1621_v6 = vsel %vm897_vm11, %v1363_v11, %v896_v15  ;;  %v1350_v11 = vld [vmem:[%s1741_s29] ss:$0 sm:$0xff] }
 0x3b4   : > { %v886_v3 = vsel %vm658_vm1, %v882_v2, 0.0 }
 0x3b5   : > { %887 = vadd.xlane.f32.xlu2 %v886_v3 }
 0x3bd   : > { %v879_v4 = vpop.f32.mrf.mxu1 }
 0x3be   : > { %v880_v5 = vadd.f32 %v1347_v63, %v879_v4 }
 0x3c0   : > { %v883_v8 = vadd.f32 %v880_v5, %v1587_v7 }
 0x3c2   : > { %v889_v9 = vsel %vm658_vm1, %v883_v8, 0.0 }
 0x3c3   : > { %890 = vadd.xlane.f32.xlu0 %v889_v9  ;;  %v987_v9 = vld [vmem:[%s1555_s21 + $0x8] sm:$0xff] }
 0x428   : > { %v888_v16 = vpop.xlane.xlu2 %887 }
 0x429   : > { %v899_v17 = vmul.f32 %v1621_v6, %v888_v16 }
 0x42b   : > { %v901_v7 = vsub.f32 %v882_v2, %v899_v17 }
 0x42d   : > { %v903_v18 = vmul.f32 %v901_v7, %v901_v7 }
 0x42f   : > { %v905_v19 = vsel %vm658_vm1, %v903_v18, 0.0 }
 0x430   : > { %906 = vadd.xlane.f32.xlu2 %v905_v19 }
 0x436   : > { %v891_v20 = vpop.xlane.xlu0 %890 }
 0x437   : > { %v900_v21 = vmul.f32 %v1621_v6, %v891_v20 }
 0x439   : > { %v1626_v22 = vsub.f32 %v883_v8, %v900_v21  ;;  %v988_v8 = vld [vmem:[%s1555_s21 + $0x10] sm:$0xff] }
 0x43a   : > { %1019 = vmatpush.msra.mxu0 %v988_v8 }
 0x43b   : > { %v904_v23 = vmul.f32 %v1626_v22, %v1626_v22 }
 0x43c   : > { %1020 = vmatpush.msra.mxu0 %v987_v9 }
 0x43d   : > { %v908_v24 = vsel %vm658_vm1, %v904_v23, 0.0 }
 0x43e   : > { %909 = vadd.xlane.f32.xlu2 %v908_v24  ;;  %1021 = vmatpush.msra.mxu0 %v986_v10 }
 0x4a3   : > { %v907_v29 = vpop.xlane.xlu2 %906 }
 0x4a4   : > { %v911_v30 = vmul.f32 %v907_v29, %v1621_v6 }
 0x4a6   : > { %v913_v31 = vadd.f32 1e-05, %v911_v30 }
 0x4a8   : > { %1364 = vrsqrt.f32 %v913_v31  ;;  %vm921_vm13 = vweird.f32 %v913_v31 }
 0x4ae   : > { %v1365_v32 = vpop.eup %1364 }
 0x4af   : > { %v916_v35 = vmul.f32 %v1365_v32, %v913_v31  ;;  %vm922_vm12 = vweird.f32 %v1365_v32 }
 0x4b0   : > { %vm923_vm14 = vmor %vm921_vm13, %vm922_vm12 }
 0x4b1   : > { %v917_v37 = vmul.f32 %v1365_v32, %v916_v35  ;;  %v910_v38 = vpop.xlane.xlu2 %909 }
 0x4b2   : > { %v912_v39 = vmul.f32 %v910_v38, %v1621_v6 }
 0x4b3   : > { %v918_v41 = vmul.f32 0.5, %v917_v37 }
 0x4b4   : > { %v914_v42 = vadd.f32 1e-05, %v912_v39 }
 0x4b5   : > { %v919_v44 = vsub.f32 1.5, %v918_v41 }
 0x4b6   : > { %1366 = vrsqrt.f32 %v914_v42  ;;  %vm931_vm0 = vweird.f32 %v914_v42 }
 0x4b7   : > { %v920_v46 = vmul.f32 %v1365_v32, %v919_v44 }
 0x4b9   : > { %v924_v49 = vsel %vm923_vm14, %v1365_v32, %v920_v46 }
 0x4ba   : > { %v935_v50 = vmul.f32 %v924_v49, %v901_v7  ;;  %v1351_v7 = vld [vmem:[%s625_s28] ss:$0 sm:$0xff] }
 0x4bc   : > { %v1367_v53 = vpop.eup %1366  ;;  %v940_v54 = vmul.f32 %v1348_v47, %v935_v50  ;;  %v1353_v50 = vld [vmem:[%s637_s18] ss:$0 sm:$0xff] }
 0x4bd   : > { %v926_v56 = vmul.f32 %v1367_v53, %v914_v42  ;;  %vm932_vm15 = vweird.f32 %v1367_v53 }
 0x4be   : > { %v945_v57 = vadd.f32 %v1349_v51, %v940_v54  ;;  %vm933_vm2 = vmor %vm931_vm0, %vm932_vm15 }
 0x4bf   : > { %v927_v59 = vmul.f32 %v1367_v53, %v926_v56 }
 0x4c0   : > { %1300 = vmatmul.msk.f32.vlgmr.msrb.gmra.mxu2 %vm658_vm1, %v945_v57 }
 0x4c1   : > { %v928_v61 = vmul.f32 0.5, %v927_v59 }
 0x4c3   : > { %v929_v63 = vsub.f32 1.5, %v928_v61 }
 0x4c5   : > { %v930_v1 = vmul.f32 %v1367_v53, %v929_v63 }
 0x4c7   : > { %v934_v2 = vsel %vm933_vm2, %v1367_v53, %v930_v1 }
 0x4c8   : > { %v936_v3 = vmul.f32 %v934_v2, %v1626_v22 }
 0x4ca   : > { %v941_v4 = vmul.f32 %v1348_v47, %v936_v3 }
 0x4cc   : > { %v946_v5 = vadd.f32 %v1349_v51, %v941_v4 }
 0x4ce   : > { %1301 = vmatmul.msk.f32.gmra.mxu2 %vm658_vm1, %v946_v5 }
 0x543   : > { %v978_v12 = vpop.f32.mrf.mxu2 }
 0x544   : > { %v979_v13 = vadd.f32 %v1350_v11, %v978_v12 }
 0x546   : > { %v984_v14 = vmax.f32 %v979_v13, 0.0 }
 0x548   : > { %1022 = vmatmul.f32.vlgmr.msra.gmra.mxu0 %v984_v14 }
 0x551   : > { %v981_v15 = vpop.f32.mrf.mxu2 }
 0x552   : > { %v982_v16 = vadd.f32 %v1350_v11, %v981_v15 }
 0x554   : > { %v985_v17 = vmax.f32 %v982_v16, 0.0 }
 0x556   : > { %1025 = vmatmul.f32.gmra.mxu0 %v985_v17 }
 0x5c5   : > { %v1023_v18 = vpop.f32.mrf.mxu0 }
 0x5c6   : > { %v1024_v19 = vadd.f32 %v1351_v7, %v1023_v18 }
 0x5c8   : > { %v1029_v20 = vadd.f32 %v1024_v19, %v945_v57 }
 0x5ca   : > { %v1033_v21 = vsel %vm658_vm1, %v1029_v20, 0.0 }
 0x5cb   : > { %1034 = vadd.xlane.f32.xlu2 %v1033_v21 }
 0x5d3   : > { %v1026_v22 = vpop.f32.mrf.mxu0 }
 0x5d4   : > { %v1027_v23 = vadd.f32 %v1351_v7, %v1026_v22 }
 0x5d6   : > { %v1030_v24 = vadd.f32 %v1027_v23, %v946_v5 }
 0x5d8   : > { %v1036_v25 = vsel %vm658_vm1, %v1030_v24, 0.0 }
 0x5d9   : > { %1037 = vadd.xlane.f32.xlu1 %v1036_v25 }
 0x63e   : > { %v1035_v26 = vpop.xlane.xlu2 %1034 }
 0x63f   : > { %v1039_v27 = vmul.f32 %v1035_v26, %v1621_v6 }
 0x641   : > { %v1041_v28 = vsub.f32 %v1029_v20, %v1039_v27 }
 0x643   : > { %v1043_v29 = vmul.f32 %v1041_v28, %v1041_v28 }
 0x645   : > { %v1045_v30 = vsel %vm658_vm1, %v1043_v29, 0.0 }
 0x646   : > { %1046 = vadd.xlane.f32.xlu2 %v1045_v30 }
 0x64c   : > { %v1038_v31 = vpop.xlane.xlu1 %1037 }
 0x64d   : > { %v1040_v32 = vmul.f32 %v1038_v31, %v1621_v6 }
 0x64f   : > { %v1042_v33 = vsub.f32 %v1030_v24, %v1040_v32 }
 0x651   : > { %v1044_v34 = vmul.f32 %v1042_v33, %v1042_v33 }
 0x653   : > { %v1048_v35 = vsel %vm658_vm1, %v1044_v34, 0.0 }
 0x654   : > { %1049 = vadd.xlane.f32.xlu2 %v1048_v35 }
 0x6b9   : > { %v1047_v36 = vpop.xlane.xlu2 %1046 }
 0x6ba   : > { %v1051_v37 = vmul.f32 %v1047_v36, %v1621_v6 }
 0x6bc   : > { %v1053_v38 = vadd.f32 1e-05, %v1051_v37 }
 0x6be   : > { %1368 = vrsqrt.f32 %v1053_v38  ;;  %vm1061_vm4 = vweird.f32 %v1053_v38 }
 0x6c4   : > { %v1369_v39 = vpop.eup %1368 }
 0x6c5   : > { %v1056_v40 = vmul.f32 %v1369_v39, %v1053_v38  ;;  %vm1062_vm3 = vweird.f32 %v1369_v39 }
 0x6c6   : > { %vm1063_vm5 = vmor %vm1061_vm4, %vm1062_vm3 }
 0x6c7   : > { %v1057_v41 = vmul.f32 %v1369_v39, %v1056_v40  ;;  %v1050_v42 = vpop.xlane.xlu2 %1049 }
 0x6c8   : > { %v1052_v43 = vmul.f32 %v1050_v42, %v1621_v6 }
 0x6c9   : > { %v1058_v44 = vmul.f32 0.5, %v1057_v41 }
 0x6ca   : > { %v1054_v45 = vadd.f32 1e-05, %v1052_v43 }
 0x6cb   : > { %v1059_v46 = vsub.f32 1.5, %v1058_v44 }
 0x6cc   : > { %1370 = vrsqrt.f32 %v1054_v45  ;;  %vm1071_vm7 = vweird.f32 %v1054_v45 }
 0x6cd   : > { %v1060_v47 = vmul.f32 %v1369_v39, %v1059_v46 }
 0x6cf   : > { %v1064_v49 = vsel %vm1063_vm5, %v1369_v39, %v1060_v47 }
 0x6d0   : > { %v1075_v6 = vmul.f32 %v1064_v49, %v1041_v28 }
 0x6d2   : > { %v1371_v51 = vpop.eup %1370  ;;  %v1080_v52 = vmul.f32 %v1352_v48, %v1075_v6 }
 0x6d3   : > { %v1066_v53 = vmul.f32 %v1371_v51, %v1054_v45  ;;  %vm1072_vm6 = vweird.f32 %v1371_v51 }
 0x6d4   : > { %v1085_v54 = vadd.f32 %v1353_v50, %v1080_v52  ;;  %vm1073_vm8 = vmor %vm1071_vm7, %vm1072_vm6 }
 0x6d5   : > { %v1067_v55 = vmul.f32 %v1371_v51, %v1066_v53 }
 0x6d6   : > { %1087 = vst.msk [vmem:[#allocation2] sm:$0xff] %vm658_vm1, %v1085_v54 }
 0x6d7   : > { %v1068_v56 = vmul.f32 0.5, %v1067_v55 }
 0x6d9   : > { %v1069_v57 = vsub.f32 1.5, %v1068_v56 }
 0x6db   : > { %v1070_v58 = vmul.f32 %v1371_v51, %v1069_v57 }
 0x6dd   : > { %v1074_v59 = vsel %vm1073_vm8, %v1371_v51, %v1070_v58 }
 0x6de   : > { %v1076_v60 = vmul.f32 %v1074_v59, %v1042_v33 }
 0x6e0   : > { %v1081_v61 = vmul.f32 %v1352_v48, %v1076_v60 }
 0x6e2   : > { %v1086_v62 = vadd.f32 %v1353_v50, %v1081_v61 }
 0x6e4   : > { %1088 = vst.msk [vmem:[#allocation2 + $0x8] sm:$0xff] %vm658_vm1, %v1086_v62 }
 0x6e5   : > { %1311 = dma.vmem_to_hbm [thread:$0]  (%p1314_p6), %s1098_s30, 256, %s1100_s15, [#allocation3], %s1432_s27, %s1432_s27, %s1433_s23  }
 0x6e6   : > { %1413 = dma.done.wait (%p1314_p6), [#allocation3], 256  }
 0x6e7   : > { %1415 = vsyncadd (%p1314_p6), [#allocation3], 4294967040 }
 0x6e8 PF: > { %s1745_s1 = sld [smem:[#allocation6_spill]] }
 0x6e9   : > { %s1746_s25 = sld [smem:[#allocation5_spill]] }
 0x6ea   : > { %s1747_s26 = sld [smem:[#allocation7_spill]] }
 0x6ee   : > { %s24_s27 = sadd.s32 1, %s1745_s1  }
 0x6ef   : > { %p21_p7 = scmp.ge.s32.totalorder %s24_s27, 4  }
 0x6f1   :  { %23 = sbr.rel (!%p21_p7) target bundleno = 8 (0x8), region = 140 }
 0x6f6   :  { %1116 = vsyncpa [#allocation3], 1 }
 0x6f7   :  { %1118 = vsyncpa [#allocation3 + $0x1], 1 }

</bundles_post_ra>
